<compile_context>
chip_gen: v7x
topology: tpu7x:2x2x1
jax: 0.10.0
libtpu: 0.0.40
codegen_flags: <defaults>
</compile_context>

<pallas_src>
import functools

import jax
import jax.numpy as jnp
from jax.experimental import pallas as pl
from jax.experimental.pallas import tpu as pltpu


def _pro2d_kernel(x_ref, p_ref, out_ref, *, n, tb):
    """Per-block kernel.

    x_ref:   VMEM (TB, C, H*W)  -- TB samples' feature maps
    p_ref:   VMEM (TB, 1, C)    -- pre-gathered class prototypes for the block
    out_ref: VMEM (1, 1, TB)    -- per-sample sum of |x_p - p| (samples on lanes)
    """
    c = x_ref.shape[1]

    x = x_ref[...].astype(jnp.float32)                     # (TB, C, HW)
    x_a = jnp.mean(x, axis=2)                              # (TB, C) spatial mean

    x_mean = jnp.mean(x_a, axis=1, keepdims=True)          # (TB, 1)
    centered = x_a - x_mean
    # unbiased std (torch.std default: correction = 1); guard C == 1
    denom = float(max(c - 1, 1))
    var = jnp.sum(centered * centered, axis=1, keepdims=True) / denom
    x_std = jnp.sqrt(var)                                  # (TB, 1)
    x_p = centered / (x_std + 1e-5)                        # (TB, C)

    p = p_ref[...].astype(jnp.float32)                     # (TB, 1, C)
    p = p.reshape(p.shape[0], p.shape[2])                  # (TB, C)

    sums = jnp.sum(jnp.abs(x_p - p), axis=1).reshape(1, 1, tb)   # (1, 1, TB)

    if n % tb != 0:
        # Last block hangs off the end of the batch: samples past N read
        # unspecified (out-of-bounds) data -- zero their contribution.
        b = pl.program_id(0)
        lane = jax.lax.broadcasted_iota(jnp.int32, (1, 1, tb), 2)
        sums = jnp.where(b * tb + lane < n, sums, 0.0)
    out_ref[...] = sums


def _choose_tb(n, c, hw, target_bytes=4 << 20):
    """Samples per block: ~target_bytes of f32 working set per input block."""
    per_sample_f32 = c * hw * 4
    tb = int(min(max(1, target_bytes // per_sample_f32), n, 1024))
    if 8 <= tb < n:
        tb = (tb // 8) * 8   # keep the sample (sublane) axis of the (TB, C)
                             # intermediates 8-aligned; never exceeds budget
    return max(tb, 1)


def pro2d_forward(x, y, patterns, training=True, block_samples=None):
    """JAX/Pallas equivalent of PRO2d.forward. Returns (x, loss)."""
    if not training:
        return x, jnp.float32(0.0)

    n, c, h, w = x.shape
    hw = h * w
    x3 = x.reshape(n, c, hw)              # free reshape; keep native dtype (bf16 ok)

    # Prototype gather in the wrapper: tiny (num_classes, C) table -> (N, 1, C).
    p = patterns[y.astype(jnp.int32)].reshape(n, 1, patterns.shape[1])

    tb = block_samples if block_samples is not None else _choose_tb(n, c, hw)
    tb = int(min(tb, n))
    n_blocks = pl.cdiv(n, tb)

    grid_spec = pltpu.PrefetchScalarGridSpec(
        num_scalar_prefetch=0,
        grid=(n_blocks,),
        in_specs=[
            # TB samples' (C, H*W) slabs per step; last two dims == full dims
            pl.BlockSpec((tb, c, hw), lambda b: (b, 0, 0)),
            # matching pre-gathered prototypes; last two dims == full dims
            pl.BlockSpec((tb, 1, c), lambda b: (b, 0, 0)),
        ],
        # per-step output block: samples on the lane axis, always in-bounds
        out_specs=pl.BlockSpec((1, 1, tb), lambda b: (b, 0, 0)),
    )

    per_sample_abs_sum = pl.pallas_call(
        functools.partial(_pro2d_kernel, n=n, tb=tb),
        out_shape=jax.ShapeDtypeStruct((n_blocks, 1, tb), jnp.float32),
        grid_spec=grid_spec,
        compiler_params=pltpu.CompilerParams(
            dimension_semantics=("parallel",),   # distinct output block per step
            vmem_limit_bytes=32 << 20,
        ),
    )(x3, p)

    # L1Loss(reduction="mean") over all N*C elements (out-of-range rows are 0)
    loss = jnp.sum(per_sample_abs_sum) / (n * c)
    return x, loss


def _reference_forward(x, y, patterns):
    """Pure-JAX reference mirroring the PyTorch code (for verification)."""
    x_a = jnp.mean(x, axis=(2, 3))
    x_mean = jnp.mean(x_a, axis=1, keepdims=True)
    x_std = jnp.std(x_a, axis=1, keepdims=True, ddof=1)
    x_p = (x_a - x_mean) / (x_std + 1e-5)
    p = patterns[y]
    return x, jnp.mean(jnp.abs(x_p - p))


if __name__ == "__main__":
    num_classes = 10
    num_features = 4          # == channel count C
    batch, chans, height, width = 2, num_features, 16, 16

    key = jax.random.PRNGKey(0)
    k_pat, k_x, k_y = jax.random.split(key, 3)

    # deterministic "torch.randn"-style parameter init
    patterns = jax.random.normal(k_pat, (num_classes, num_features), jnp.float32)
    x = jax.random.normal(k_x, (batch, chans, height, width), jnp.float32)
    y = jax.random.randint(k_y, (batch,), 0, num_classes, jnp.int32)

    x_out, loss = jax.block_until_ready(pro2d_forward(x, y, patterns,
                                                      training=True))

    # verify against pure-JAX reference
    x_ref, loss_ref = _reference_forward(x, y, patterns)
    assert x_out.shape == x.shape and jnp.allclose(x_out, x_ref)
    assert jnp.allclose(loss, loss_ref, atol=1e-5, rtol=1e-5), (loss, loss_ref)

    # second check: uneven batch / multi-block path (grid boundary masking)
    batch2 = 5
    k_x2, k_y2 = jax.random.split(k_y)
    x2 = jax.random.normal(k_x2, (batch2, chans, height, width), jnp.float32)
    y2 = jax.random.randint(k_y2, (batch2,), 0, num_classes, jnp.int32)
    _, loss2 = jax.block_until_ready(
        pro2d_forward(x2, y2, patterns, training=True, block_samples=2))
    _, loss2_ref = _reference_forward(x2, y2, patterns)
    assert jnp.allclose(loss2, loss2_ref, atol=1e-5, rtol=1e-5), (loss2, loss2_ref)

    print("KERNEL_OK")
</pallas_src>

<mosaic_0001>
module attributes {stable_mosaic.version = 11 : i64} {
  func.func @_pro2d_kernel(%arg0: i32, %arg1: memref<2x4x256xf32, #tpu.memory_space<vmem>>, %arg2: memref<2x1x4xf32, #tpu.memory_space<vmem>>, %arg3: memref<1x1x2xf32, #tpu.memory_space<vmem>>) attributes {dimension_semantics = [#tpu.dimension_semantics<parallel>], iteration_bounds = array<i64: 1>, scalar_prefetch = 0 : i64, scratch_operands = 0 : i64, tpu.core_type = #tpu.core_type<tc>, window_params = [{transform_indices = @transform_0, window_bounds = array<i64: 2, 4, 256>}, {transform_indices = @transform_1, window_bounds = array<i64: 2, 1, 4>}, {transform_indices = @transform_2, window_bounds = array<i64: 1, 1, 2>}]} {
    %c0 = arith.constant 0 : index
    %c0_0 = arith.constant 0 : index
    %c0_1 = arith.constant 0 : index
    %0 = vector.load %arg1[%c0, %c0_0, %c0_1] : memref<2x4x256xf32, #tpu.memory_space<vmem>>, vector<2x4x256xf32>
    %cst = arith.constant dense<0.000000e+00> : vector<2x4xf32>
    %1 = vector.multi_reduction <add>, %0, %cst [2] : vector<2x4x256xf32> to vector<2x4xf32>
    %cst_2 = arith.constant 2.560000e+02 : f32
    %2 = vector.broadcast %cst_2 : f32 to vector<2x4xf32>
    %3 = arith.divf %1, %2 : vector<2x4xf32>
    %cst_3 = arith.constant dense<0.000000e+00> : vector<2xf32>
    %4 = vector.multi_reduction <add>, %3, %cst_3 [1] : vector<2x4xf32> to vector<2xf32>
    %5 = vector.shape_cast %4 : vector<2xf32> to vector<2x1xf32>
    %cst_4 = arith.constant 4.000000e+00 : f32
    %6 = vector.broadcast %cst_4 : f32 to vector<2x1xf32>
    %7 = arith.divf %5, %6 : vector<2x1xf32>
    %8 = vector.broadcast %7 : vector<2x1xf32> to vector<2x4xf32>
    %9 = arith.subf %3, %8 : vector<2x4xf32>
    %10 = arith.mulf %9, %9 : vector<2x4xf32>
    %cst_5 = arith.constant dense<0.000000e+00> : vector<2xf32>
    %11 = vector.multi_reduction <add>, %10, %cst_5 [1] : vector<2x4xf32> to vector<2xf32>
    %12 = vector.shape_cast %11 : vector<2xf32> to vector<2x1xf32>
    %cst_6 = arith.constant 3.000000e+00 : f32
    %13 = vector.broadcast %cst_6 : f32 to vector<2x1xf32>
    %14 = arith.divf %12, %13 : vector<2x1xf32>
    %15 = math.sqrt %14 : vector<2x1xf32>
    %cst_7 = arith.constant 9.99999974E-6 : f32
    %16 = vector.broadcast %cst_7 : f32 to vector<2x1xf32>
    %17 = arith.addf %15, %16 : vector<2x1xf32>
    %18 = vector.broadcast %17 : vector<2x1xf32> to vector<2x4xf32>
    %19 = arith.divf %9, %18 : vector<2x4xf32>
    %c0_8 = arith.constant 0 : index
    %c0_9 = arith.constant 0 : index
    %c0_10 = arith.constant 0 : index
    %20 = vector.load %arg2[%c0_8, %c0_9, %c0_10] : memref<2x1x4xf32, #tpu.memory_space<vmem>>, vector<2x1x4xf32>
    %21 = vector.shape_cast %20 : vector<2x1x4xf32> to vector<2x4xf32>
    %22 = arith.subf %19, %21 : vector<2x4xf32>
    %23 = math.absf %22 : vector<2x4xf32>
    %cst_11 = arith.constant dense<0.000000e+00> : vector<2xf32>
    %24 = vector.multi_reduction <add>, %23, %cst_11 [1] : vector<2x4xf32> to vector<2xf32>
    %25 = vector.shape_cast %24 : vector<2xf32> to vector<1x1x2xf32>
    %c0_12 = arith.constant 0 : index
    %c0_13 = arith.constant 0 : index
    %c0_14 = arith.constant 0 : index
    %26 = vector.load %arg3[%c0_12, %c0_13, %c0_14] : memref<1x1x2xf32, #tpu.memory_space<vmem>>, vector<1x1x2xf32>
    tpu.vector_store %arg3[%c0_12, %c0_13, %c0_14], %25 {strides = array<i32>} : memref<1x1x2xf32, #tpu.memory_space<vmem>>, vector<1x1x2xf32>,
    return
  }
  func.func @transform_0(%arg0: i32) -> (i32, i32, i32) {
    %c0_i32 = arith.constant 0 : i32
    %c0_i32_0 = arith.constant 0 : i32
    %c0_i32_1 = arith.constant 0 : i32
    return %arg0, %c0_i32, %c0_i32_0 : i32, i32, i32
  }
  func.func @transform_1(%arg0: i32) -> (i32, i32, i32) {
    %c0_i32 = arith.constant 0 : i32
    %c0_i32_0 = arith.constant 0 : i32
    %c0_i32_1 = arith.constant 0 : i32
    return %arg0, %c0_i32, %c0_i32_0 : i32, i32, i32
  }
  func.func @transform_2(%arg0: i32) -> (i32, i32, i32) {
    %c0_i32 = arith.constant 0 : i32
    %c0_i32_0 = arith.constant 0 : i32
    %c0_i32_1 = arith.constant 0 : i32
    return %arg0, %c0_i32, %c0_i32_0 : i32, i32, i32
  }
}

</mosaic_0001>

<bundles_post_ra>
// kernel: tpu_custom_call.1
= control target key start
LH: loop header
LB: loop body
LE: loop exit
PB: predicated region body
PF: predicated region fallthrough
CT: control target
= control target key end

     0   :  { %7 = vsyncpa [#allocation3], 0  ;;  %s328_s0 = inlined_call_operand.hbm [shape: f32[2,4,256], index: 0, kind: input, shape index: {}]   ;;  %s329_s1 = inlined_call_operand.vmem [shape: f32[2,1,4], index: 1, kind: input, shape index: {}]   ;;  %s330_s2 = inlined_call_operand.hbm [shape: f32[1,1,2], index: 2, kind: output, shape index: {}]  }
   0x1   :  { %8 = vsyncpa [#allocation4], 0  ;;  %s263_s9 = smov [#allocation2]   ;;  %s215_s13 = scalar_lea.hbm %s328_s0, 256 }
   0x2   :  { %s14_s10 = sshll.u32 %s263_s9, 4  ;;  %p216_p0 = scmp.ne.s32.totalorder %s328_s0, %s215_s13  ;;  %s15_s10 = int_to_ptr.vmem [resolvable:$true] %s14_s10 }
   0x3   :  { %p219_p1 = scmp.lt.u32.totalorder %s215_s13, %s328_s0 }
   0x5   :  { %p221_p2 = pnand %p219_p1, %p216_p0 }
   0x7   :  { %224 = shalt.err (!%p221_p2)
}
   0x8   :  { %s225_s18 = scalar_lea.vmem %s15_s10, 256  ;;  %p230_p4 = scmp.lt.s32.totalorder %s15_s10, %s15_s10 }
   0x9   :  { %p226_p3 = scmp.ne.s32.totalorder %s15_s10, %s225_s18  ;;  %p231_p5 = scmp.lt.s32.totalorder %s225_s18, %s225_s18 }
   0xb   :  { %p232_p6 = por %p231_p5, %p230_p4 }
   0xd   :  { %p233_p7 = pnand %p232_p6, %p226_p3 }
   0xf   :  { %236 = shalt.err (!%p233_p7)
}
  0x10   :  { %s264_s19 = smov 128   ;;  %s265_s20 = smov 8  }
  0x11   :  { %20 = dma.hbm_to_vmem [thread:$0]  %s328_s0, 256, %s15_s10, [#allocation3], %s264_s19, %s264_s19, %s265_s20  }
  0x12   :  { %259 = dma.done.wait [#allocation3], 256  }
  0x13   :  { %260 = vsyncadd [#allocation3], 4294967040  ;;  %vm34_vm0 = vcmask 1043456   ;;  %v26_v0 = vld [vmem:[#allocation2] sm:$0xff]  ;;  %v27_v1 = vld [vmem:[#allocation2 + $0x8] sm:$0xff]  ;;  %v50_v10 = vlaneseq  ;;  %vm60_vm1 = vcmask 1041409  }
  0x14   :  { %v30_v2 = vcombine.high %v26_v0, %v26_v0  ;;  %v35_v3 = vsel %vm34_vm0, %v26_v0, 0.0  ;;  %v31_v4 = vcombine.high %v27_v1, %v27_v1  ;;  %v40_v6 = vsel %vm34_vm0, %v27_v1, 0.0  ;;  %v198_v33 = vld [vmem:[%s329_s1] ss:$0 sm:$0xff]  ;;  %v199_v34 = vld [vmem:[%s329_s1 + $0x1] ss:$0 sm:$0xff] }
  0x15   :  { %v51_v11 = vand.u32 127, %v50_v10  ;;  %v53_v12 = vshrl.u32 %v50_v10, 7  ;;  %vm63_vm2 = vcmask 25600   ;;  %v266_v22 = vmov 0   ;;  %s267_s1 = smov [#allocation5]  }
  0x16   :  { %v36_v5 = vsel %vm34_vm0, %v30_v2, 0.0  ;;  %v41_v7 = vsel %vm34_vm0, %v31_v4, 0.0  ;;  %206 = vset.pattern.permute.xlu0 %v266_v22  ;;  %205 = vset.pattern.permute.xlu1 %v266_v22  ;;  %s189_s26 = sshll.u32 %s267_s1, 4  ;;  %vm181_vm5 = vcmask 8192   ;;  %s190_s26 = int_to_ptr.vmem [resolvable:$true] %s189_s26 }
  0x17   :  { %v37_v8 = vadd.f32 %v36_v5, %v35_v3  ;;  %v42_v9 = vadd.f32 %v41_v7, %v40_v6  ;;  %v295_v14 = vsub.s32 %v51_v11, %v53_v12  ;;  %v72_v23 = vsub.s32 0, %v53_v12  ;;  %s237_s27 = scalar_lea.vmem %s190_s26, 16  ;;  %s241_s28 = scalar_lea.vmem %s190_s26, 32 }
  0x18   :  { %v76_v24 = vsub.s32 1, %v53_v12  ;;  %p238_p8 = scmp.ne.s32.totalorder %s190_s26, %s237_s27  ;;  %p242_p9 = scmp.lt.s32.totalorder %s190_s26, %s190_s26 }
  0x19   :  { %38 = vadd.xlane.f32.xlu0 %v37_v8  ;;  %p243_p10 = scmp.lt.s32.totalorder %s241_s28, %s237_s27 }
  0x1b   :  { %p244_p11 = por %p243_p10, %p242_p9 }
  0x1d   :  { %43 = vadd.xlane.f32.xlu0 %v42_v9  ;;  %p245_p12 = pnand %p244_p11, %p238_p8 }
  0xa6   :  { %v39_v13 = vpop.xlane.xlu0 %38 }
  0xa7   :  { %v46_v15 = vmul.f32 0.00390625, %v39_v13 }
  0xa9   :  { %v55_v18 = vrot.slane %v46_v15, %v295_v14 }
  0xaa   :  { %v44_v16 = vpop.xlane.xlu0 %43 }
  0xab   :  { %v47_v17 = vmul.f32 0.00390625, %v44_v16 }
  0xad   :  { %v59_v19 = vrot.slane %v47_v17, %v295_v14 }
  0xaf   :  { %v61_v20 = vsel %vm60_vm1, %v59_v19, %v55_v18 }
  0xb0   :  { %v64_v21 = vsel %vm63_vm2, %v61_v20, 0.0 }
  0xb1   :  { %65 = vadd.xlane.f32.xlu1 %v64_v21 }
 0x13e   :  { %v66_v25 = vpop.xlane.xlu1 %65 }
 0x13f   :  { %v68_v26 = vmul.f32 0.25, %v66_v25 }
 0x141   :  { %v73_v27 = vrot.slane %v68_v26, %v72_v23  ;;  %v77_v28 = vrot.slane %v68_v26, %v76_v24 }
 0x143   :  { %v80_v29 = vsub.f32 %v46_v15, %v73_v27  ;;  %v81_v30 = vsub.f32 %v47_v17, %v77_v28 }
 0x145   :  { %v83_v31 = vmul.f32 %v81_v30, %v81_v30  ;;  %v82_v32 = vmul.f32 %v80_v29, %v80_v29 }
 0x147   :  { %90 = vperm.xlu0 %206, %v83_v31   ;;  %87 = vperm.xlu1 %205, %v82_v32  }
 0x14b   :  { %143 = vbcast.lane.b32.xlu0 %v198_v33, 256 }
 0x14f   :  { %146 = vbcast.lane.b32.xlu0 %v199_v34, 256 }
 0x1c6   :  { %v91_v35 = vpop.permute.xlu0 %90  ;;  %v88_v36 = vpop.permute.xlu1 %87 }
 0x1c7   :  { %v99_v37 = vrot.slane %v91_v35, %v295_v14  ;;  %v95_v38 = vrot.slane %v88_v36, %v295_v14 }
 0x1c9   :  { %v100_v39 = vsel %vm60_vm1, %v99_v37, %v95_v38 }
 0x1ca   :  { %v102_v40 = vsel %vm63_vm2, %v100_v39, 0.0  ;;  %v144_v51 = vpop.permute.xlu0 %143 }
 0x1cb   :  { %103 = vadd.xlane.f32.xlu1 %v102_v40 }
 0x1ce   :  { %v147_v55 = vpop.permute.xlu0 %146 }
 0x258   :  { %v104_v41 = vpop.xlane.xlu1 %103 }
 0x259   :  { %v106_v42 = vmul.f32 0.33333334, %v104_v41 }
 0x25b   :  { %209 = vrsqrt.f32 %v106_v42  ;;  %vm109_vm3 = vcmp.eq.f32.partialorder %v106_v42, inf  ;;  %v112_v45 = vand.u32 2147483648, %v106_v42  ;;  %vm111_vm4 = vcmp.eq.f32.partialorder %v106_v42, 0.0 }
 0x265   :  { %v210_v43 = vpop.eup %209 }
 0x266   :  { %v108_v44 = vmul.f32 %v210_v43, %v106_v42 }
 0x268   :  { %v110_v46 = vsel %vm109_vm3, %v106_v42, %v108_v44 }
 0x269   :  { %v113_v47 = vsel %vm111_vm4, %v112_v45, %v110_v46 }
 0x26a   :  { %v114_v48 = vadd.f32 1e-05, %v113_v47 }
 0x26c   :  { %v119_v49 = vrot.slane %v114_v48, %v72_v23  ;;  %v123_v50 = vrot.slane %v114_v48, %v76_v24 }
 0x26e   :  { %211 = vrcp.f32 %v119_v49 }
 0x26f   :  { %213 = vrcp.f32 %v123_v50 }
 0x278   :  { %v212_v52 = vpop.eup %211 }
 0x279   :  { %v214_v53 = vpop.eup %213  ;;  %v127_v54 = vmul.f32 %v212_v52, %v80_v29 }
 0x27a   :  { %v129_v56 = vmul.f32 %v214_v53, %v81_v30 }
 0x27b   :  { %v150_v57 = vsub.f32 %v127_v54, %v144_v51 }
 0x27c   :  { %v151_v58 = vsub.f32 %v129_v56, %v147_v55 }
 0x27d   :  { %v152_v59 = vand.u32 2147483647, %v150_v57 }
 0x27e   :  { %v153_v60 = vand.u32 2147483647, %v151_v58 }
 0x27f   :  { %157 = vperm.xlu1 %205, %v152_v59  }
 0x280   :  { %160 = vperm.xlu0 %206, %v153_v60  }
 0x2fe   :  { %v158_v61 = vpop.permute.xlu1 %157 }
 0x2ff   :  { %v161_v62 = vpop.permute.xlu0 %160  ;;  %v165_v63 = vrot.slane %v158_v61, %v295_v14 }
 0x300   :  { %v169_v0 = vrot.slane %v161_v62, %v295_v14 }
 0x302   :  { %v170_v1 = vsel %vm60_vm1, %v169_v0, %v165_v63 }
 0x303   :  { %v172_v2 = vsel %vm63_vm2, %v170_v1, 0.0 }
 0x304   :  { %173 = vadd.xlane.f32.xlu0 %v172_v2 }
 0x391   :  { %v174_v3 = vpop.xlane.xlu0 %173 }
 0x392   :  { %v179_v4 = vrot.slane %v174_v3, %v295_v14 }
 0x394   :  { %182 = vst.msk [vmem:[#allocation5] sm:$0x1] %vm181_vm5, %v179_v4 }
 0x395   :  { %248 = shalt.err (!%p245_p12)
}
 0x396   :  { %s249_s3 = scalar_lea.hbm %s330_s2, 16 }
 0x397   :  { %p250_p13 = scmp.ne.s32.totalorder %s330_s2, %s249_s3  ;;  %p253_p0 = scmp.lt.u32.totalorder %s249_s3, %s330_s2 }
 0x399   :  { %p255_p1 = pnand %p253_p0, %p250_p13 }
 0x39b   :  { %258 = shalt.err (!%p255_p1)
}
 0x39c   :  { %192 = dma.vmem_to_hbm [thread:$0]  %s190_s26, 16, %s330_s2, [#allocation4]  }
 0x39d   :  { %261 = dma.done.wait [#allocation4], 16  }
 0x39e   :  { %262 = vsyncadd [#allocation4], 4294967280 }
 0x39f   :  { %196 = vsyncpa [#allocation3], 1 }
 0x3a0   :  { %197 = vsyncpa [#allocation4], 1 }

</bundles_post_ra>
